<compile_context>
chip_gen: v7x
topology: tpu7x:2x2x1
jax: 0.10.0
libtpu: 0.0.40
codegen_flags: <defaults>
</compile_context>

<pallas_src>
import functools

import jax
import jax.numpy as jnp
from jax import lax
from jax.experimental import pallas as pl
from jax.experimental.pallas import tpu as pltpu


K_CHUNK = 256  # codebook rows processed per inner step (multiple of 8)


def _round_up(a: int, b: int) -> int:
    return ((a + b - 1) // b) * b


def _vmem_capacity_bytes() -> int:
    """Physical VMEM per core; conservative 64 MiB (v7x) fallback."""
    try:
        info = pltpu.get_tpu_info()
        for name in ("vmem_capacity_bytes", "vmem_bytes", "vmem_size_bytes"):
            v = getattr(info, name, None)
            if v:
                return int(v)
    except Exception:
        pass
    return 64 << 20


def kmeans_predict_kernel(x_ref, c_ref, c2h_ref, o_ref, *, num_clusters):
    """x_ref: [TN, E], c_ref: [K, E], c2h_ref: [K, 1] f32, o_ref: [1, TN] i32."""
    x = x_ref[...]                                            # [TN, E]
    best_d = None
    best_i = None
    # Static (trace-time) loop over codebook chunks: keeps the [kc, TN] f32
    # intermediate small so the HBM-bound x tile can stay large.
    for k0 in range(0, num_clusters, K_CHUNK):
        kc = min(K_CHUNK, num_clusters - k0)
        c = c_ref[pl.ds(k0, kc), :]                           # [kc, E]
        c2h = c2h_ref[pl.ds(k0, kc), :]                       # [kc, 1] = 0.5*||c||^2
        # argmin_k ||x - c_k||^2 == argmin_k (0.5*||c_k||^2 - x.c_k); the
        # per-sample ||x||^2 term is row-constant and dropped.  c @ x.T gives
        # [kc, TN]: clusters on sublanes, samples on lanes (lane-dense).
        xc = lax.dot_general(c, x, (((1,), (1,)), ((), ())),
                             preferred_element_type=jnp.float32)   # [kc, TN]
        dist = c2h - xc                                            # [kc, TN]
        d_min = jnp.min(dist, axis=0, keepdims=True)               # [1, TN]
        iota = lax.broadcasted_iota(jnp.int32, dist.shape, 0) + k0
        cand = jnp.where(dist <= d_min, iota, num_clusters)        # ties -> min idx
        i_min = jnp.min(cand, axis=0, keepdims=True)               # [1, TN]
        if best_d is None:
            best_d, best_i = d_min, i_min
        else:
            take_new = d_min < best_d      # strict '<': earlier chunk wins ties
            best_d = jnp.where(take_new, d_min, best_d)
            best_i = jnp.where(take_new, i_min, best_i)
    o_ref[...] = best_i.astype(o_ref.dtype)


def kmeans_quantizer_forward(x, centers):
    """[B, T, E] float -> [B, T] int32 cluster indices (nearest center)."""
    B, T, E = x.shape
    K, Ec = centers.shape
    assert E == Ec
    N = B * T

    # Keep the activation dtype (kernel is HBM-bound on x; the MXU accumulates
    # in f32 via preferred_element_type).  0.5*||c||^2 is computed once in f32.
    x2d = x.reshape(N, E)
    c = centers.astype(x2d.dtype)
    c2_half = 0.5 * jnp.sum(centers.astype(jnp.float32) ** 2, axis=-1,
                            keepdims=True)                         # [K, 1] f32

    x_itemsize = jnp.dtype(x2d.dtype).itemsize
    c_itemsize = jnp.dtype(c.dtype).itemsize
    E_pad = _round_up(E, 128)            # lane padding of the minor dim
    K_pad = _round_up(K, 8)              # sublane padding of the codebook
    KC = min(K_pad, K_CHUNK)

    # ---- generation-aware tile sizing (bytes, not rows) -------------------
    vmem_cap = _vmem_capacity_bytes()
    # Raise the scoped-VMEM limit well above the defaults, with headroom.
    vmem_limit = int(min(max(int(0.70 * vmem_cap), 16 << 20), 100 << 20))
    # Larger per-step tiles on v7x (faster HBM => per-step overhead costlier).
    target_tile_bytes = (6 << 20) if vmem_cap <= (64 << 20) else (4 << 20)

    row_bytes = E_pad * x_itemsize                     # lane-padded bytes / row
    # TN-independent VMEM: double-buffered centers + 0.5*||c||^2 (lane padded).
    fixed_bytes = 2 * K_pad * E_pad * c_itemsize + 2 * K_pad * 128 * 4

    def per_tn_bytes(tn):
        return (2 * tn * row_bytes                     # double-buffered x tile
                + 2 * 8 * tn * 4                       # double-buffered [1,TN] i32 out
                + 3 * KC * tn * 4)                     # [KC,TN] dist working set

    TN = max(128, (target_tile_bytes // row_bytes) // 128 * 128)
    TN = min(TN, _round_up(N, 128))                    # don't exceed the problem
    if N > 128:                                        # >=2 grid steps (v7x megacore)
        TN = min(TN, _round_up(pl.cdiv(N, 2), 128))
    while TN > 128 and fixed_bytes + per_tn_bytes(TN) > int(0.75 * vmem_limit):
        TN -= 128
    num_tiles = pl.cdiv(N, TN)

    cost = pl.CostEstimate(
        flops=2 * N * E * K,
        transcendentals=0,
        bytes_accessed=(N * E * x_itemsize + K * E * c_itemsize + K * 4 + N * 4),
    )

    kernel = functools.partial(kmeans_predict_kernel, num_clusters=K)
    out = pl.pallas_call(
        kernel,
        out_shape=jax.ShapeDtypeStruct((1, num_tiles * TN), jnp.int32),
        grid=(num_tiles,),
        in_specs=[
            pl.BlockSpec((TN, E), lambda i: (i, 0)),   # x tile (pipelined; ragged
                                                       # last block handled by Pallas)
            pl.BlockSpec((K, E), lambda i: (0, 0)),    # centers, VMEM-resident
            pl.BlockSpec((K, 1), lambda i: (0, 0)),    # 0.5*||c||^2, VMEM-resident
        ],
        out_specs=pl.BlockSpec((1, TN), lambda i: (0, i)),
        compiler_params=pltpu.CompilerParams(
            dimension_semantics=("parallel",),
            vmem_limit_bytes=vmem_limit,
        ),
        cost_estimate=cost,
    )(x2d, c, c2_half)

    # Garbage entries from the ragged last tile are sliced off here.
    # TODO(synk): PyTorch module returns int64 ("long"); we return int32.
    return out.reshape(-1)[:N].reshape(B, T)


if __name__ == "__main__":
    # Deterministic synthetic "checkpoint": kmeans cluster centers.
    # TODO(synk): real module loads a sklearn KMeans via joblib; centers are synthesized.
    B, T, E, K = 2, 8, 32, 16
    key = jax.random.PRNGKey(0)
    k_centers, k_x = jax.random.split(key)
    centers = jax.random.normal(k_centers, (K, E), dtype=jnp.float32)
    x = jax.random.normal(k_x, (B, T, E), dtype=jnp.float32)

    res = jax.block_until_ready(kmeans_quantizer_forward(x, centers))

    # Pure-JAX reference (full squared-distance argmin semantics).
    x2d = x.reshape(B * T, E)
    d_ref = (jnp.sum(x2d ** 2, -1, keepdims=True)
             - 2.0 * x2d @ centers.T
             + jnp.sum(centers ** 2, -1)[None, :])
    ref = jnp.argmin(d_ref, axis=-1).astype(jnp.int32).reshape(B, T)
    assert res.shape == (B, T) and res.dtype == jnp.int32
    assert bool(jnp.all(res == ref))
    print("KERNEL_OK")
</pallas_src>

<mosaic_0001>
module attributes {stable_mosaic.version = 11 : i64} {
  func.func @kmeans_predict_kernel(%arg0: i32, %arg1: memref<128x32xf32, #tpu.memory_space<vmem>>, %arg2: memref<16x32xf32, #tpu.memory_space<vmem>>, %arg3: memref<16x1xf32, #tpu.memory_space<vmem>>, %arg4: memref<1x128xi32, #tpu.memory_space<vmem>>) attributes {dimension_semantics = [#tpu.dimension_semantics<parallel>], iteration_bounds = array<i64: 1>, scalar_prefetch = 0 : i64, scratch_operands = 0 : i64, tpu.core_type = #tpu.core_type<tc>, window_params = [{transform_indices = @transform_0, window_bounds = array<i64: 128, 32>}, {pipeline_mode = #tpu.pipeline_mode<synchronous>, transform_indices = @transform_1, window_bounds = array<i64: 16, 32>}, {pipeline_mode = #tpu.pipeline_mode<synchronous>, transform_indices = @transform_2, window_bounds = array<i64: 16, 1>}, {transform_indices = @transform_3, window_bounds = array<i64: 1, 128>}]} {
    %c0 = arith.constant 0 : index
    %c0_0 = arith.constant 0 : index
    %0 = vector.load %arg1[%c0, %c0_0] : memref<128x32xf32, #tpu.memory_space<vmem>>, vector<128x32xf32>
    %c0_1 = arith.constant 0 : index
    %c0_2 = arith.constant 0 : index
    %1 = vector.load %arg2[%c0_1, %c0_2] : memref<16x32xf32, #tpu.memory_space<vmem>>, vector<16x32xf32>
    %c0_3 = arith.constant 0 : index
    %c0_4 = arith.constant 0 : index
    %2 = vector.load %arg3[%c0_3, %c0_4] : memref<16x1xf32, #tpu.memory_space<vmem>>, vector<16x1xf32>
    %cst = arith.constant dense<0.000000e+00> : vector<16x128xf32>
    %3 = tpu.matmul %1, %0, %cst {dimension_numbers = #tpu.dot_dimension_numbers<[1], [1], [0], [0], [0, 0, 1, 0], [], []>} : vector<16x32xf32>, vector<128x32xf32>, vector<16x128xf32> -> vector<16x128xf32>
    %4 = vector.broadcast %2 : vector<16x1xf32> to vector<16x128xf32>
    %5 = arith.subf %4, %3 : vector<16x128xf32>
    %cst_5 = arith.constant dense<0x7F800000> : vector<128xf32>
    %6 = vector.multi_reduction <minimumf>, %5, %cst_5 [0] : vector<16x128xf32> to vector<128xf32>
    %7 = vector.shape_cast %6 : vector<128xf32> to vector<1x128xf32>
    %8 = tpu.iota {dimensions = array<i32: 0>} : vector<16x128xi32>
    %c0_i32 = arith.constant 0 : i32
    %9 = vector.broadcast %c0_i32 : i32 to vector<16x128xi32>
    %10 = arith.addi %8, %9 : vector<16x128xi32>
    %11 = vector.broadcast %7 : vector<1x128xf32> to vector<16x128xf32>
    %12 = arith.cmpf ole, %5, %11 : vector<16x128xf32>
    %c16_i32 = arith.constant 16 : i32
    %13 = vector.broadcast %c16_i32 : i32 to vector<16x128xi32>
    %14 = arith.select %12, %10, %13 : vector<16x128xi1>, vector<16x128xi32>
    %cst_6 = arith.constant dense<2147483647> : vector<128xi32>
    %15 = vector.multi_reduction <minsi>, %14, %cst_6 [0] : vector<16x128xi32> to vector<128xi32>
    %16 = vector.shape_cast %15 : vector<128xi32> to vector<1x128xi32>
    %c0_7 = arith.constant 0 : index
    %c0_8 = arith.constant 0 : index
    %17 = vector.load %arg4[%c0_7, %c0_8] : memref<1x128xi32, #tpu.memory_space<vmem>>, vector<1x128xi32>
    tpu.vector_store %arg4[%c0_7, %c0_8], %16 {strides = array<i32>} : memref<1x128xi32, #tpu.memory_space<vmem>>, vector<1x128xi32>,
    return
  }
  func.func @transform_0(%arg0: i32) -> (i32, i32) {
    %c0_i32 = arith.constant 0 : i32
    %c0_i32_0 = arith.constant 0 : i32
    return %arg0, %c0_i32 : i32, i32
  }
  func.func @transform_1(%arg0: i32) -> (i32, i32) {
    %c0_i32 = arith.constant 0 : i32
    %c0_i32_0 = arith.constant 0 : i32
    %c0_i32_1 = arith.constant 0 : i32
    return %c0_i32, %c0_i32_0 : i32, i32
  }
  func.func @transform_2(%arg0: i32) -> (i32, i32) {
    %c0_i32 = arith.constant 0 : i32
    %c0_i32_0 = arith.constant 0 : i32
    %c0_i32_1 = arith.constant 0 : i32
    return %c0_i32, %c0_i32_0 : i32, i32
  }
  func.func @transform_3(%arg0: i32) -> (i32, i32) {
    %c0_i32 = arith.constant 0 : i32
    %c0_i32_0 = arith.constant 0 : i32
    return %c0_i32, %arg0 : i32, i32
  }
}

</mosaic_0001>

<bundles_post_ra>
// kernel: tpu_custom_call.1
= control target key start
LH: loop header
LB: loop body
LE: loop exit
PB: predicated region body
PF: predicated region fallthrough
CT: control target
= control target key end

     0   :  { %8 = vsyncpa [#allocation3], 0  ;;  %s548_s0 = inlined_call_operand.vmem [shape: f32[16,32], index: 0, kind: input, shape index: {}]   ;;  %s549_s1 = inlined_call_operand.hbm [shape: f32[16,32], index: 1, kind: input, shape index: {}]   ;;  %s550_s2 = inlined_call_operand.vmem [shape: f32[16,1], index: 2, kind: input, shape index: {}]   ;;  %s551_s3 = inlined_call_operand.hbm [shape: s32[1,128], index: 3, kind: output, shape index: {}]  }
   0x1   :  { %9 = vsyncpa [#allocation4], 0  ;;  %s405_s12 = smov [#allocation2]   ;;  %s357_s16 = scalar_lea.hbm %s549_s1, 256 }
   0x2   :  { %s17_s13 = sshll.u32 %s405_s12, 4  ;;  %p358_p0 = scmp.ne.s32.totalorder %s549_s1, %s357_s16  ;;  %s18_s13 = int_to_ptr.vmem [resolvable:$true] %s17_s13 }
   0x3   :  { %p361_p1 = scmp.lt.u32.totalorder %s357_s16, %s549_s1 }
   0x5   :  { %p363_p2 = pnand %p361_p1, %p358_p0 }
   0x7   :  { %366 = shalt.err (!%p363_p2)
}
   0x8   :  { %s367_s21 = scalar_lea.vmem %s18_s13, 256  ;;  %p372_p4 = scmp.lt.s32.totalorder %s18_s13, %s18_s13 }
   0x9   :  { %p368_p3 = scmp.ne.s32.totalorder %s18_s13, %s367_s21  ;;  %p373_p5 = scmp.lt.s32.totalorder %s367_s21, %s367_s21 }
   0xb   :  { %p374_p6 = por %p373_p5, %p372_p4 }
   0xd   :  { %p375_p7 = pnand %p374_p6, %p368_p3 }
   0xf   :  { %378 = shalt.err (!%p375_p7)
}
  0x10   :  { %s406_s22 = smov 128   ;;  %s407_s23 = smov 8  }
  0x11   :  { %23 = dma.hbm_to_vmem [thread:$0]  %s549_s1, 256, %s18_s13, [#allocation3], %s406_s22, %s406_s22, %s407_s23  }
  0x12   :  { %401 = dma.done.wait [#allocation3], 256  }
  0x13   :  { %402 = vsyncadd [#allocation3], 4294967040  ;;  %v408_v0 = vmov 0   ;;  %vm49_vm0 = vcmask 261120   ;;  %v29_v2 = vld [vmem:[%s548_s0] sm:$0xff]  ;;  %v30_v3 = vld [vmem:[%s548_s0 + $0x8] sm:$0xff]  ;;  %v198_v38 = vlaneseq }
  0x14   :  { %356 = vset.pattern.permute.xlu0 %v408_v0  ;;  %vm444_vm1 = vmpackc.low %vm49_vm0, %vm49_vm0  ;;  %v31_v4 = vld [vmem:[%s548_s0 + $0x10] sm:$0xff]  ;;  %v303_v5 = vpack.c.bf16 %v30_v3, %v29_v2  ;;  %v32_v6 = vld [vmem:[%s548_s0 + $0x18] sm:$0xff] }
  0x15   :  { %v309_v7 = vpack.c.bf16 %v32_v6, %v31_v4  ;;  %v45_v8 = vld [vmem:[#allocation2] sm:$0xff]  ;;  %v34_v10 = vld [vmem:[%s548_s0 + $0x28] sm:$0xff]  ;;  %v35_v14 = vld [vmem:[%s548_s0 + $0x30] sm:$0xff]  ;;  %v199_v41 = vshrl.u32 %v198_v38, 7 }
  0x16   :  { %305 = vmatprep.subr.msk.bf16.mxu0 %vm444_vm1, %v303_v5  ;;  %v33_v9 = vld [vmem:[%s548_s0 + $0x20] sm:$0xff]  ;;  %300 = vmatprep.mubr.msk.f32.mxu0 %vm49_vm0, %v45_v8  ;;  %v48_v12 = vld [vmem:[%s550_s2 + $0x8] sm:$0xff]  ;;  %v36_v15 = vld [vmem:[%s548_s0 + $0x38] sm:$0xff] }
  0x17   :  { %308 = vmatpush3.bf16.xpose.msk.msra.mxu0 %vm444_vm1, %v303_v5  ;;  %v47_v11 = vld [vmem:[%s550_s2] sm:$0xff]  ;;  %v315_v13 = vpack.c.bf16 %v34_v10, %v33_v9  ;;  %v321_v16 = vpack.c.bf16 %v36_v15, %v35_v14  ;;  %v38_v18 = vld [vmem:[%s548_s0 + $0x48] sm:$0xff]  ;;  %v39_v20 = vld [vmem:[%s548_s0 + $0x50] sm:$0xff]  ;;  %v200_v44 = vadd.s32 8, %v199_v41 }
  0x18   :  { %311 = vmatprep.subr.msk.bf16.mxu0 %vm444_vm1, %v309_v7  ;;  %181 = vperm.xlu0 %356, %v47_v11   ;;  %v37_v17 = vld [vmem:[%s548_s0 + $0x40] sm:$0xff]  ;;  %v40_v21 = vld [vmem:[%s548_s0 + $0x58] sm:$0xff]  ;;  %v42_v24 = vld [vmem:[%s548_s0 + $0x68] sm:$0xff] }
  0x19   :  { %v327_v19 = vpack.c.bf16 %v38_v18, %v37_v17  ;;  %v333_v22 = vpack.c.bf16 %v40_v21, %v39_v20  ;;  %v41_v23 = vld [vmem:[%s548_s0 + $0x60] sm:$0xff]  ;;  %v43_v26 = vld [vmem:[%s548_s0 + $0x70] sm:$0xff]  ;;  %v44_v27 = vld [vmem:[%s548_s0 + $0x78] sm:$0xff]  ;;  %s409_s0 = smov [#allocation5]  }
  0x1a   :  { %v339_v25 = vpack.c.bf16 %v42_v24, %v41_v23  ;;  %v345_v28 = vpack.c.bf16 %v44_v27, %v43_v26  ;;  %v46_v29 = vld [vmem:[#allocation2 + $0x8] sm:$0xff]  ;;  %s223_s5 = sshll.u32 %s409_s0, 4  ;;  %s224_s5 = int_to_ptr.vmem [resolvable:$true] %s223_s5 }
  0x1b   :  { %s379_s6 = scalar_lea.vmem %s224_s5, 16  ;;  %s383_s7 = scalar_lea.vmem %s224_s5, 32 }
  0x1c   :  { %186 = vperm.xlu0 %356, %v48_v12   ;;  %p380_p8 = scmp.ne.s32.totalorder %s224_s5, %s379_s6  ;;  %p384_p9 = scmp.lt.s32.totalorder %s224_s5, %s224_s5 }
  0x1d   :  { %p385_p10 = scmp.lt.s32.totalorder %s383_s7, %s379_s6 }
  0x1f   :  { %314 = vmatpush3.bf16.xpose.msk.msra.mxu0 %vm444_vm1, %v309_v7  ;;  %p386_p11 = por %p385_p10, %p384_p9 }
  0x20   :  { %317 = vmatprep.subr.msk.bf16.mxu0 %vm444_vm1, %v315_v13 }
  0x21   :  { %p387_p12 = pnand %p386_p11, %p380_p8 }
  0x27   :  { %320 = vmatpush3.bf16.xpose.msk.msra.mxu0 %vm444_vm1, %v315_v13 }
  0x28   :  { %323 = vmatprep.subr.msk.bf16.mxu0 %vm444_vm1, %v321_v16 }
  0x2f   :  { %326 = vmatpush3.bf16.xpose.msk.msra.mxu0 %vm444_vm1, %v321_v16 }
  0x30   :  { %329 = vmatprep.subr.msk.bf16.mxu0 %vm444_vm1, %v327_v19 }
  0x37   :  { %332 = vmatpush3.bf16.xpose.msk.msra.mxu0 %vm444_vm1, %v327_v19 }
  0x38   :  { %335 = vmatprep.subr.msk.bf16.mxu0 %vm444_vm1, %v333_v22 }
  0x3f   :  { %338 = vmatpush3.bf16.xpose.msk.msra.mxu0 %vm444_vm1, %v333_v22 }
  0x40   :  { %341 = vmatprep.subr.msk.bf16.mxu0 %vm444_vm1, %v339_v25 }
  0x47   :  { %344 = vmatpush3.bf16.xpose.msk.msra.mxu0 %vm444_vm1, %v339_v25 }
  0x48   :  { %347 = vmatprep.subr.msk.bf16.mxu0 %vm444_vm1, %v345_v28 }
  0x4f   :  { %350 = vmatpush3.bf16.xpose.msk.msra.mxu0 %vm444_vm1, %v345_v28 }
  0x56   :  { %301 = vmatmul.mubr.msk.f32.vlgmr.msra.gmra.mrb[0].mxu0 %vm49_vm0, %v46_v29 }
  0x97   :  { %v182_v30 = vpop.permute.xlu0 %181 }
  0x9b   :  { %v187_v31 = vpop.permute.xlu0 %186 }
 0x129   :  { %v302_v32 = vpop.f32.mrb[0].mxu0 }
 0x12a   :  { %v190_v33 = vsub.f32 %v187_v31, %v302_v32  ;;  %v170_v34 = vpop.f32.mrb[1].mxu0 }
 0x12b   :  { %v189_v35 = vsub.f32 %v182_v30, %v170_v34 }
 0x12d   :  { %v191_v36 = vmin.f32 %v189_v35, %v190_v33 }
 0x12f   :  { %v192_v37 = vrot.slane %v191_v36, 4 }
 0x131   :  { %v193_v39 = vmin.f32 %v191_v36, %v192_v37 }
 0x133   :  { %v194_v40 = vrot.slane %v193_v39, 2 }
 0x135   :  { %v195_v42 = vmin.f32 %v193_v39, %v194_v40 }
 0x137   :  { %v196_v43 = vrot.slane %v195_v42, 1 }
 0x139   :  { %v197_v45 = vmin.f32 %v195_v42, %v196_v43 }
 0x13b   :  { %vm201_vm2 = vcmp.le.f32.partialorder %v189_v35, %v197_v45  ;;  %vm202_vm3 = vcmp.le.f32.partialorder %v190_v33, %v197_v45 }
 0x13c   :  { %v203_v46 = vsel %vm201_vm2, %v199_v41, 16  ;;  %v204_v47 = vsel %vm202_vm3, %v200_v44, 16 }
 0x13d   :  { %vm205_vm4 = vcmp.lt.s32.totalorder %v203_v46, %v204_v47 }
 0x13e   :  { %v206_v48 = vsel %vm205_vm4, %v203_v46, %v204_v47 }
 0x13f   :  { %v207_v49 = vrot.slane %v206_v48, 4 }
 0x141   :  { %vm208_vm5 = vcmp.lt.s32.totalorder %v206_v48, %v207_v49 }
 0x142   :  { %v209_v50 = vsel %vm208_vm5, %v206_v48, %v207_v49 }
 0x143   :  { %v210_v51 = vrot.slane %v209_v50, 2 }
 0x145   :  { %vm211_vm6 = vcmp.lt.s32.totalorder %v209_v50, %v210_v51 }
 0x146   :  { %v212_v52 = vsel %vm211_vm6, %v209_v50, %v210_v51 }
 0x147   :  { %v213_v53 = vrot.slane %v212_v52, 1 }
 0x149   :  { %vm214_vm7 = vcmp.lt.s32.totalorder %v212_v52, %v213_v53 }
 0x14a   :  { %v215_v54 = vsel %vm214_vm7, %v212_v52, %v213_v53 }
 0x14b   :  { %216 = vst [vmem:[#allocation5] sm:$0x1] %v215_v54 }
 0x14c   :  { %390 = shalt.err (!%p387_p12)
}
 0x14d   :  { %s391_s10 = scalar_lea.hbm %s551_s3, 16 }
 0x14e   :  { %p392_p13 = scmp.ne.s32.totalorder %s551_s3, %s391_s10  ;;  %p395_p0 = scmp.lt.u32.totalorder %s391_s10, %s551_s3 }
 0x150   :  { %p397_p1 = pnand %p395_p0, %p392_p13 }
 0x152   :  { %400 = shalt.err (!%p397_p1)
}
 0x153   :  { %226 = dma.vmem_to_hbm [thread:$0]  %s224_s5, 16, %s551_s3, [#allocation4]  }
 0x154   :  { %403 = dma.done.wait [#allocation4], 16  }
 0x155   :  { %404 = vsyncadd [#allocation4], 4294967280 }
 0x156   :  { %230 = vsyncpa [#allocation3], 1 }
 0x157   :  { %231 = vsyncpa [#allocation4], 1 }

</bundles_post_ra>
